<compile_context>
chip_gen: v7x
topology: tpu7x:2x2x1
jax: 0.10.0
libtpu: 0.0.40
codegen_flags: <defaults>
</compile_context>

<pallas_src>
import functools

import jax
import jax.numpy as jnp
import numpy as np
from jax.experimental import pallas as pl
from jax.experimental.pallas import tpu as pltpu


def _header_rows(num_hidden):
    """Rows reserved at the top of row_buf for the small per-layer vectors,
    rounded up to a sublane multiple so the stacked (H,H) weights stay
    8-aligned."""
    return max(8, ((num_hidden + 1 + 7) // 8) * 8)


def _hypernet_kernel(num_hidden, *refs):
    """refs layout:
      num_hidden == 0: (x_smem, wb_last, out)
      num_hidden >= 1: (x_smem, row_buf, col_buf, wb_last, out)

    row_buf : (base + (L-1)*H, H) f32
              row 0 = W0 (flattened), row 1 = b0, rows 2..L = biases of hidden
              layers 1..L-1; rows base+.. = stacked (H,H) hidden weights,
              pre-transposed per layer parity ([out,in] when h enters as a row,
              [in,out] when h enters as a column).
    col_buf : (H, L+1) f32 — transpose of row_buf's header rows (same vectors,
              column-oriented), so no in-kernel transposes are needed.
    wb_last : (last_in+1, TN) tile of the bf16 last-layer slab; rows
              0..last_in-1 = W_last, row last_in = b_last.
    """
    x_ref = refs[0]
    o_ref = refs[-1]
    wb_ref = refs[-2]

    x = x_ref[0]                                   # scalar from SMEM
    wb = wb_ref[...].astype(jnp.float32)           # (last_in+1, TN)
    last_in = wb.shape[0] - 1

    if num_hidden == 0:
        # Single Linear(1, O): pure VPU broadcast-scale.
        o_ref[...] = x * wb[0:1, :] + wb[1:2, :]
        return

    row_ref = refs[1]
    col_ref = refs[2]
    L = num_hidden
    H = row_ref.shape[1]
    base = _header_rows(L)

    # First hidden layer: Linear(1, H) + ReLU as a VPU scale.  Starting
    # orientation is chosen so the chain ends with h as a COLUMN (H, 1).
    if L % 2 == 1:
        h = jnp.maximum(x * col_ref[:, 0:1] + col_ref[:, 1:2], 0.0)   # (H, 1)
    else:
        h = jnp.maximum(x * row_ref[0:1, :] + row_ref[1:2, :], 0.0)   # (1, H)

    # Remaining hidden layers: VPU broadcast-multiply + XLU reduce (no MXU).
    # Each layer flips row<->column orientation; weights were pre-transposed
    # at prepare time to match.  Unrolled at trace time.
    for l in range(1, L):
        w = row_ref[base + (l - 1) * H: base + l * H, :]              # (H, H)
        if (L - l) % 2 == 1:
            # h is a row (1,H); w stored [out,in]; reduce over lanes -> column.
            h = jnp.maximum(
                jnp.sum(h * w, axis=1, keepdims=True) + col_ref[:, l + 1:l + 2],
                0.0)                                                  # (H, 1)
        else:
            # h is a column (H,1); w stored [in,out]; reduce over sublanes -> row.
            h = jnp.maximum(
                jnp.sum(h * w, axis=0, keepdims=True) + row_ref[l + 1:l + 2, :],
                0.0)                                                  # (1, H)

    # Final layer for this output tile: h is a (H,1) column; broadcast across
    # the lane-dense tile, multiply, sublane-reduce, add bias row.  Lane-dense
    # (TN multiple of 128) unmasked store.
    o_ref[...] = (jnp.sum(h * wb[:last_in, :], axis=0, keepdims=True)
                  + wb[last_in:, :])


def make_hypernet_forward(params, out_size1, out_size2, *,
                          last_dtype=jnp.bfloat16, max_tile_n=1024):
    """One-time prepare step: packs parameters into device buffers and returns
    a jitted forward(x) closure whose per-call work is a single pallas_call.

    params: list of (W[in, out], b[out]) pairs (note: transposed vs. PyTorch).
    """
    num_hidden = len(params) - 1
    out_size = out_size1 * out_size2
    # Lane-dense output: pad the flat width up to a multiple of 128.
    o_pad = max(128, ((out_size + 127) // 128) * 128)
    # Largest output tile (multiple of 128) that divides o_pad, capped.
    tn = 128
    for cand in (1024, 512, 256, 128):
        if cand <= max_tile_n and o_pad % cand == 0:
            tn = cand
            break
    n_tiles = o_pad // tn

    # --- Last layer: weight rows + bias row, zero-padded columns, bf16. ------
    w_last, b_last = params[-1]
    last_in = w_last.shape[0]
    wb = jnp.zeros((last_in + 1, o_pad), jnp.float32)
    wb = wb.at[:last_in, :out_size].set(jnp.asarray(w_last, jnp.float32))
    wb = wb.at[last_in, :out_size].set(jnp.asarray(b_last, jnp.float32))
    wb_last = wb.astype(last_dtype)

    const_args = []
    in_specs = [pl.BlockSpec(memory_space=pltpu.MemorySpace.SMEM)]   # x scalar

    # --- Small header vectors + stacked hidden weights in ONE f32 slab. ------
    if num_hidden >= 1:
        H = params[0][0].shape[1]
        base = _header_rows(num_hidden)
        n_rows = base + (num_hidden - 1) * H
        row_buf = jnp.zeros((n_rows, H), jnp.float32)
        row_buf = row_buf.at[0].set(
            jnp.asarray(params[0][0], jnp.float32).reshape(H))
        row_buf = row_buf.at[1].set(jnp.asarray(params[0][1], jnp.float32))
        for l in range(1, num_hidden):
            row_buf = row_buf.at[l + 1].set(
                jnp.asarray(params[l][1], jnp.float32))
            w = jnp.asarray(params[l][0], jnp.float32)     # [in, out]
            if (num_hidden - l) % 2 == 1:                  # h enters as a row
                w = w.T                                    # store [out, in]
            row_buf = row_buf.at[base + (l - 1) * H: base + l * H, :].set(w)
        col_buf = row_buf[:num_hidden + 1, :].T            # (H, L+1) columns
        const_args += [row_buf, col_buf]
        in_specs += [
            pl.BlockSpec((n_rows, H), lambda j: (0, 0)),          # resident
            pl.BlockSpec((H, num_hidden + 1), lambda j: (0, 0)),  # resident
        ]

    # Streamed / double-buffered last-layer tiles.
    in_specs.append(pl.BlockSpec((last_in + 1, tn), lambda j: (0, j)))
    const_args.append(wb_last)

    kernel = functools.partial(_hypernet_kernel, num_hidden)

    call = pl.pallas_call(
        kernel,
        out_shape=jax.ShapeDtypeStruct((1, o_pad), jnp.float32),
        grid=(n_tiles,),
        in_specs=in_specs,
        out_specs=pl.BlockSpec((1, tn), lambda j: (0, j)),
        compiler_params=pltpu.CompilerParams(
            dimension_semantics=("parallel",)),
    )

    packed = tuple(jax.device_put(a) for a in const_args)

    @jax.jit
    def _fwd(x, consts):
        x_smem = jnp.asarray(x, jnp.float32).reshape(1)
        out = call(x_smem, *consts)
        # glue: drop lane padding and reshape, mirroring .view(O1, O2)
        return out[0, :out_size].reshape(out_size1, out_size2)

    def forward(x):
        return _fwd(x, packed)

    return forward


def init_hypernet_params(key, hidden_layer_num, hidden_size, out_size1, out_size2):
    """Deterministic init mimicking torch.nn.Linear defaults
    (U[-1/sqrt(in), 1/sqrt(in)]).  Weights stored as [in, out]."""
    out_size = out_size1 * out_size2
    dims = [1] + [hidden_size] * hidden_layer_num + [out_size]
    params = []
    for i in range(len(dims) - 1):
        fan_in, fan_out = dims[i], dims[i + 1]
        key, kw, kb = jax.random.split(key, 3)
        bound = 1.0 / jnp.sqrt(jnp.float32(fan_in))
        w = jax.random.uniform(kw, (fan_in, fan_out), jnp.float32, -bound, bound)
        b = jax.random.uniform(kb, (fan_out,), jnp.float32, -bound, bound)
        params.append((w, b))
    return params


def reference_forward(x, params, out_size1, out_size2, last_dtype=None):
    """Host-side (numpy f32) reference.  If last_dtype is set, the last layer's
    parameters are rounded through that dtype, matching the kernel's bf16
    storage of the last-layer slab."""
    n_layers = len(params)
    h = np.asarray(x, np.float32).reshape(1, 1)
    for i, (w, b) in enumerate(params):
        if i == n_layers - 1 and last_dtype is not None:
            w = np.asarray(jnp.asarray(w).astype(last_dtype).astype(jnp.float32))
            b = np.asarray(jnp.asarray(b).astype(last_dtype).astype(jnp.float32))
        else:
            w = np.asarray(w, np.float32)
            b = np.asarray(b, np.float32)
        h = h @ w + b.reshape(1, -1)
        if i < n_layers - 1:
            h = np.maximum(h, 0.0)
    return h.reshape(out_size1, out_size2)


if __name__ == "__main__":
    # Small, module-consistent configurations exercising: 0/1/2/3 hidden layers
    # (both GEMV parities), a non-128-multiple output (lane padding + slice),
    # and a multi-tile output grid.
    configs = [
        (2, 32, 8, 16),    # out_size = 128 (lane-dense, single tile)
        (1, 32, 8, 16),
        (0, 32, 8, 16),
        (3, 32, 8, 16),    # odd hidden count -> column-start parity path
        (2, 32, 7, 9),     # out_size = 63 -> padded to 128, sliced in wrapper
        (2, 32, 16, 24),   # out_size = 384 -> 3 output tiles on the grid
    ]

    key = jax.random.PRNGKey(0)
    for (hidden_layer_num, hidden_size, out_size1, out_size2) in configs:
        key, kp, kx = jax.random.split(key, 3)
        params = init_hypernet_params(
            kp, hidden_layer_num, hidden_size, out_size1, out_size2)
        x = jax.random.normal(kx, (1,), jnp.float32)  # HyperNet input: one scalar

        fwd = make_hypernet_forward(params, out_size1, out_size2)  # prepare once
        out = jax.block_until_ready(fwd(x))                        # hot path
        ref = reference_forward(x, params, out_size1, out_size2,
                                last_dtype=jnp.bfloat16)

        assert out.shape == (out_size1, out_size2)
        # Tolerance covers f32 associativity differences between the kernel's
        # VPU/XLU reduction order and numpy's BLAS; structural errors would be O(1).
        assert np.allclose(np.asarray(out), ref, atol=1e-4, rtol=1e-4), (
            f"mismatch vs reference for config "
            f"{(hidden_layer_num, hidden_size, out_size1, out_size2)}; "
            f"max abs err = {np.max(np.abs(np.asarray(out) - ref))}"
        )

    print("KERNEL_OK")
</pallas_src>

<mosaic_0001>
module attributes {stable_mosaic.version = 11 : i64} {
  func.func @_hypernet_kernel(%arg0: i32, %arg1: memref<1xf32, #tpu.memory_space<smem>>, %arg2: memref<40x32xf32, #tpu.memory_space<vmem>>, %arg3: memref<32x3xf32, #tpu.memory_space<vmem>>, %arg4: memref<33x128xbf16, #tpu.memory_space<vmem>>, %arg5: memref<1x128xf32, #tpu.memory_space<vmem>>) attributes {dimension_semantics = [#tpu.dimension_semantics<parallel>], iteration_bounds = array<i64: 1>, scalar_prefetch = 0 : i64, scratch_operands = 0 : i64, tpu.core_type = #tpu.core_type<tc>, window_params = [{transform_indices = @transform_0, window_bounds = array<i64: 1>}, {pipeline_mode = #tpu.pipeline_mode<synchronous>, transform_indices = @transform_1, window_bounds = array<i64: 40, 32>}, {pipeline_mode = #tpu.pipeline_mode<synchronous>, transform_indices = @transform_2, window_bounds = array<i64: 32, 3>}, {transform_indices = @transform_3, window_bounds = array<i64: 33, 128>}, {transform_indices = @transform_4, window_bounds = array<i64: 1, 128>}]} {
    %c0 = arith.constant 0 : index
    %0 = memref.load %arg1[%c0] : memref<1xf32, #tpu.memory_space<smem>>
    %c0_0 = arith.constant 0 : index
    %c0_1 = arith.constant 0 : index
    %1 = vector.load %arg4[%c0_0, %c0_1] : memref<33x128xbf16, #tpu.memory_space<vmem>>, vector<33x128xbf16>
    %2 = arith.extf %1 : vector<33x128xbf16> to vector<33x128xf32>
    %c0_2 = arith.constant 0 : index
    %c0_3 = arith.constant 0 : index
    %3 = vector.load %arg2[%c0_2, %c0_3] : memref<40x32xf32, #tpu.memory_space<vmem>>, vector<1x32xf32>
    %4 = vector.broadcast %0 : f32 to vector<1x32xf32>
    %5 = arith.mulf %4, %3 : vector<1x32xf32>
    %c1 = arith.constant 1 : index
    %c0_4 = arith.constant 0 : index
    %6 = vector.load %arg2[%c1, %c0_4] : memref<40x32xf32, #tpu.memory_space<vmem>>, vector<1x32xf32>
    %7 = arith.addf %5, %6 : vector<1x32xf32>
    %cst = arith.constant 0.000000e+00 : f32
    %8 = vector.broadcast %cst : f32 to vector<1x32xf32>
    %9 = arith.maximumf %7, %8 : vector<1x32xf32>
    %c8 = arith.constant 8 : index
    %c0_5 = arith.constant 0 : index
    %10 = vector.load %arg2[%c8, %c0_5] : memref<40x32xf32, #tpu.memory_space<vmem>>, vector<32x32xf32>
    %11 = vector.broadcast %9 : vector<1x32xf32> to vector<32x32xf32>
    %12 = arith.mulf %11, %10 : vector<32x32xf32>
    %cst_6 = arith.constant dense<0.000000e+00> : vector<32xf32>
    %13 = vector.multi_reduction <add>, %12, %cst_6 [1] : vector<32x32xf32> to vector<32xf32>
    %14 = vector.shape_cast %13 : vector<32xf32> to vector<32x1xf32>
    %c0_7 = arith.constant 0 : index
    %c2 = arith.constant 2 : index
    %15 = vector.load %arg3[%c0_7, %c2] : memref<32x3xf32, #tpu.memory_space<vmem>>, vector<32x1xf32>
    %16 = arith.addf %14, %15 : vector<32x1xf32>
    %cst_8 = arith.constant 0.000000e+00 : f32
    %17 = vector.broadcast %cst_8 : f32 to vector<32x1xf32>
    %18 = arith.maximumf %16, %17 : vector<32x1xf32>
    %19 = vector.extract_strided_slice %2 {offsets = [0, 0], sizes = [32, 128], strides = [1, 1]} : vector<33x128xf32> to vector<32x128xf32>
    %20 = vector.broadcast %18 : vector<32x1xf32> to vector<32x128xf32>
    %21 = arith.mulf %20, %19 : vector<32x128xf32>
    %cst_9 = arith.constant dense<0.000000e+00> : vector<128xf32>
    %22 = vector.multi_reduction <add>, %21, %cst_9 [0] : vector<32x128xf32> to vector<128xf32>
    %23 = vector.shape_cast %22 : vector<128xf32> to vector<1x128xf32>
    %24 = vector.extract_strided_slice %2 {offsets = [32, 0], sizes = [1, 128], strides = [1, 1]} : vector<33x128xf32> to vector<1x128xf32>
    %25 = arith.addf %23, %24 : vector<1x128xf32>
    %c0_10 = arith.constant 0 : index
    %c0_11 = arith.constant 0 : index
    %26 = vector.load %arg5[%c0_10, %c0_11] : memref<1x128xf32, #tpu.memory_space<vmem>>, vector<1x128xf32>
    tpu.vector_store %arg5[%c0_10, %c0_11], %25 {strides = array<i32>} : memref<1x128xf32, #tpu.memory_space<vmem>>, vector<1x128xf32>,
    return
  }
  func.func @transform_0(%arg0: i32) -> i32 {
    %c0_i32 = arith.constant 0 : i32
    %c0_i32_0 = arith.constant 0 : i32
    return %c0_i32 : i32
  }
  func.func @transform_1(%arg0: i32) -> (i32, i32) {
    %c0_i32 = arith.constant 0 : i32
    %c0_i32_0 = arith.constant 0 : i32
    %c0_i32_1 = arith.constant 0 : i32
    return %c0_i32, %c0_i32_0 : i32, i32
  }
  func.func @transform_2(%arg0: i32) -> (i32, i32) {
    %c0_i32 = arith.constant 0 : i32
    %c0_i32_0 = arith.constant 0 : i32
    %c0_i32_1 = arith.constant 0 : i32
    return %c0_i32, %c0_i32_0 : i32, i32
  }
  func.func @transform_3(%arg0: i32) -> (i32, i32) {
    %c0_i32 = arith.constant 0 : i32
    %c0_i32_0 = arith.constant 0 : i32
    return %c0_i32, %arg0 : i32, i32
  }
  func.func @transform_4(%arg0: i32) -> (i32, i32) {
    %c0_i32 = arith.constant 0 : i32
    %c0_i32_0 = arith.constant 0 : i32
    return %c0_i32, %arg0 : i32, i32
  }
}

</mosaic_0001>

<bundles_post_ra>
// kernel: squeeze.1
= control target key start
LH: loop header
LB: loop body
LE: loop exit
PB: predicated region body
PF: predicated region fallthrough
CT: control target
= control target key end

     0   :  { %s135_s0 = inlined_call_operand.vmem [shape: f32[128], index: 0, kind: input, shape index: {}]   ;;  %s136_s1 = inlined_call_operand.hbm [shape: f32[8,16], index: 1, kind: output, shape index: {}]  }
   0x1   :  { %v5_v0 = vld [vmem:[%s135_s0] sm:$0x1] }
   0x2   :  { %6 = vst [vmem:[#allocation2] sm:$0x1] %v5_v0 }
   0x3   :  { %2 = vsyncpa [#allocation1], 0  ;;  %s94_s0 = smov 112   ;;  %s95_s8 = smov 80   ;;  %vm8_vm0 = vcmask 130048  }
   0x4   :  { %s96_s9 = smov 96   ;;  %s97_s10 = smov 64  }
   0x5   :  { %s98_s11 = smov 48   ;;  %s99_s12 = smov 32  }
   0x6   :  { %s100_s13 = smov 16   ;;  %s101_s14 = smov [#allocation0]  }
   0x7   :  { %s56_s15 = sshll.u32 %s101_s14, 4  ;;  %s57_s15 = int_to_ptr.vmem [resolvable:$true] %s56_s15 }
   0x8   :  { %s70_s16 = scalar_lea.vmem %s57_s15, 128  ;;  %p75_p1 = scmp.lt.s32.totalorder %s57_s15, %s57_s15 }
   0x9   :  { %v10_v1 = vld [vmem:[#allocation2] sm:$0x1]   ;;  %p71_p0 = scmp.ne.s32.totalorder %s57_s15, %s70_s16  ;;  %p76_p2 = scmp.lt.s32.totalorder %s70_s16, %s70_s16 }
   0xa   :  { %v22_v2 = vld [vmem:[#allocation2] sm:$0x1]   ;;  %11 = vrot.lane.b32.xlu0 %v10_v1, %s94_s0 }
   0xb   :  { %23 = vrot.lane.b32.xlu1 %v22_v2, %s95_s8  ;;  %v16_v3 = vld [vmem:[#allocation2] sm:$0x1]   ;;  %p77_p3 = por %p76_p2, %p75_p1 }
   0xc   :  { %v28_v4 = vld [vmem:[#allocation2] sm:$0x1]  }
   0xd   :  { %v7_v5 = vld [vmem:[#allocation2] sm:$0x1]   ;;  %p78_p4 = pnand %p77_p3, %p71_p0 }
   0xe   :  { %9 = vst.msk [vmem:[#allocation0] sm:$0x1] %vm8_vm0, %v7_v5   ;;  %17 = vrot.lane.b32.xlu0 %v16_v3, %s96_s9  ;;  %v34_v6 = vld [vmem:[#allocation2] sm:$0x1]  }
   0xf   :  { %29 = vrot.lane.b32.xlu1 %v28_v4, %s97_s10  ;;  %v40_v7 = vld [vmem:[#allocation2] sm:$0x1]  }
  0x10   :  { %v46_v8 = vld [vmem:[#allocation2] sm:$0x1]  }
  0x12   :  { %35 = vrot.lane.b32.xlu0 %v34_v6, %s98_s11 }
  0x13   :  { %41 = vrot.lane.b32.xlu1 %v40_v7, %s99_s12 }
  0x16   :  { %47 = vrot.lane.b32.xlu0 %v46_v8, %s100_s13 }
  0x7c   :  { %v12_v9 = vpop.permute.xlu0 %11  }
  0x7d   :  { %v24_v10 = vpop.permute.xlu1 %23   ;;  %15 = vst.msk [vmem:[#allocation0 + $0x1] sm:$0x1] %vm8_vm0, %v12_v9  }
  0x7e   :  { %27 = vst.msk [vmem:[#allocation0 + $0x3] sm:$0x1] %vm8_vm0, %v24_v10  }
  0x80   :  { %v18_v11 = vpop.permute.xlu0 %17  }
  0x81   :  { %v30_v12 = vpop.permute.xlu1 %29   ;;  %21 = vst.msk [vmem:[#allocation0 + $0x2] sm:$0x1] %vm8_vm0, %v18_v11  }
  0x82   :  { %33 = vst.msk [vmem:[#allocation0 + $0x4] sm:$0x1] %vm8_vm0, %v30_v12  }
  0x84   :  { %v36_v13 = vpop.permute.xlu0 %35  }
  0x85   :  { %v42_v14 = vpop.permute.xlu1 %41   ;;  %39 = vst.msk [vmem:[#allocation0 + $0x5] sm:$0x1] %vm8_vm0, %v36_v13  }
  0x86   :  { %45 = vst.msk [vmem:[#allocation0 + $0x6] sm:$0x1] %vm8_vm0, %v42_v14  }
  0x88   :  { %v48_v15 = vpop.permute.xlu0 %47  }
  0x89   :  { %51 = vst.msk [vmem:[#allocation0 + $0x7] sm:$0x1] %vm8_vm0, %v48_v15  }
  0x8a   :  { %81 = shalt.err (!%p78_p4)
}
  0x8b   :  { %s82_s19 = scalar_lea.hbm %s136_s1, 128 }
  0x8c   :  { %p83_p5 = scmp.ne.s32.totalorder %s136_s1, %s82_s19  ;;  %p86_p6 = scmp.lt.u32.totalorder %s82_s19, %s136_s1 }
  0x8e   :  { %p88_p7 = pnand %p86_p6, %p83_p5 }
  0x90   :  { %91 = shalt.err (!%p88_p7)
}
  0x91   :  { %59 = dma.vmem_to_hbm [thread:$0]  %s57_s15, 128, %s136_s1, [#allocation1]  }
  0x92   :  { %92 = dma.done.wait [#allocation1], 128  }
  0x93   :  { %93 = vsyncadd [#allocation1], 4294967168 }
  0x94   :  { %61 = vsyncpa [#allocation1], 1 }

// kernel: _fwd.1
= control target key start
LH: loop header
LB: loop body
LE: loop exit
PB: predicated region body
PF: predicated region fallthrough
CT: control target
= control target key end

     0   :  { %v39_v0 = vlaneseq  ;;  %vm47_vm0 = vcmask 261120   ;;  %v123_v22 = vmov 2   ;;  %s194_s0 = inlined_call_operand.<no memory space> [shape: f32[1], index: 0, kind: input, shape index: {}]   ;;  %s195_s1 = inlined_call_operand.vmem [shape: f32[40,32], index: 1, kind: input, shape index: {}]   ;;  %s196_s2 = inlined_call_operand.vmem [shape: f32[32,3], index: 2, kind: input, shape index: {}]   ;;  %s197_s3 = inlined_call_operand.vmem [shape: bf16[33,128], index: 3, kind: input, shape index: {}]   ;;  %s198_s4 = inlined_call_operand.vmem [shape: f32[1,128], index: 4, kind: output, shape index: {}]  }
   0x1   :  { %v29_v1 = vld [vmem:[%s195_s1] sm:$0x1]  ;;  %v30_v2 = vstv %s194_s0  ;;  %v32_v3 = vld [vmem:[%s195_s1 + $0x1] sm:$0x1]  ;;  %v35_v9 = vld [vmem:[%s195_s1 + $0x8] sm:$0xff]  ;;  %121 = vset.pattern.permute.xlu0 %v123_v22  ;;  %122 = vset.pattern.permute.xlu1 %v123_v22 }
   0x2   :  { %v31_v4 = vmul.f32 %v30_v2, %v29_v1  ;;  %v40_v5 = vshrl.u32 %v39_v0, 7  ;;  %v36_v10 = vld [vmem:[%s195_s1 + $0x10] sm:$0xff]  ;;  %v37_v11 = vld [vmem:[%s195_s1 + $0x18] sm:$0xff]  ;;  %v38_v12 = vld [vmem:[%s195_s1 + $0x20] sm:$0xff] }
   0x3   :  { %v60_v23 = vld [vmem:[%s196_s2] sm:$0xff]  ;;  %v61_v27 = vld [vmem:[%s196_s2 + $0x8] sm:$0xff]  ;;  %v62_v28 = vld [vmem:[%s196_s2 + $0x10] sm:$0xff] }
   0x4   :  { %v33_v6 = vadd.f32 %v32_v3, %v31_v4  ;;  %v41_v7 = vsub.s32 0, %v40_v5  ;;  %v63_v33 = vld [vmem:[%s196_s2 + $0x18] sm:$0xff]  ;;  %v112_v39 = vld [vmem:[%s197_s3] sm:$0xff]   ;;  %v119_v40 = vld [vmem:[%s197_s3 + $0x8] sm:$0xff]  }
   0x5   :  { %v114_v41 = vunpack.c.h.bf16 %v112_v39  ;;  %v113_v43 = vunpack.c.l.bf16 %v112_v39  ;;  %v117_v44 = vunpack.c.l.bf16 %v119_v40  ;;  %v118_v50 = vunpack.c.h.bf16 %v119_v40  ;;  %v23_v59 = vld [vmem:[%s197_s3 + $0x10] sm:$0x1] }
   0x6   :  { %v34_v8 = vmax.f32 %v33_v6, 0.0  ;;  %v28_v61 = vunpack.c.l.bf16 %v23_v59 }
   0x8   :  { %v42_v13 = vrot.slane %v34_v8, %v41_v7 }
   0xa   :  { %v43_v14 = vmul.f32 %v42_v13, %v35_v9  ;;  %v44_v15 = vmul.f32 %v42_v13, %v36_v10  ;;  %v45_v16 = vmul.f32 %v42_v13, %v37_v11  ;;  %v46_v17 = vmul.f32 %v42_v13, %v38_v12 }
   0xc   :  { %v48_v18 = vsel %vm47_vm0, %v43_v14, 0.0  ;;  %v54_v19 = vsel %vm47_vm0, %v45_v16, 0.0  ;;  %v51_v20 = vsel %vm47_vm0, %v44_v15, 0.0  ;;  %v57_v21 = vsel %vm47_vm0, %v46_v17, 0.0 }
   0xd   :  { %49 = vadd.xlane.f32.xlu0 %v48_v18  ;;  %55 = vadd.xlane.f32.xlu1 %v54_v19 }
  0x11   :  { %52 = vadd.xlane.f32.xlu0 %v51_v20  ;;  %58 = vadd.xlane.f32.xlu1 %v57_v21 }
  0x9a   :  { %v50_v24 = vpop.xlane.xlu0 %49  ;;  %v56_v25 = vpop.xlane.xlu1 %55 }
  0x9b   :  { %v64_v26 = vadd.f32 %v60_v23, %v50_v24  ;;  %v66_v32 = vadd.f32 %v62_v28, %v56_v25 }
  0x9d   :  { %v68_v29 = vmax.f32 %v64_v26, 0.0  ;;  %v70_v36 = vmax.f32 %v66_v32, 0.0 }
  0x9e   :  { %v53_v30 = vpop.xlane.xlu0 %52  ;;  %v59_v34 = vpop.xlane.xlu1 %58 }
  0x9f   :  { %v65_v31 = vadd.f32 %v61_v27, %v53_v30  ;;  %74 = vperm.xlu0 %121, %v68_v29   ;;  %v67_v37 = vadd.f32 %v63_v33, %v59_v34 }
  0xa1   :  { %v69_v35 = vmax.f32 %v65_v31, 0.0  ;;  %v71_v38 = vmax.f32 %v67_v37, 0.0 }
  0xa3   :  { %79 = vperm.xlu1 %122, %v69_v35  }
  0xa7   :  { %84 = vperm.xlu1 %122, %v70_v36  }
  0xab   :  { %89 = vperm.xlu1 %122, %v71_v38  }
 0x11e   :  { %v75_v45 = vpop.permute.xlu0 %74 }
 0x11f   :  { %v92_v48 = vmul.f32 %v113_v43, %v75_v45 }
 0x122   :  { %v80_v42 = vpop.permute.xlu1 %79 }
 0x123   :  { %v93_v46 = vmul.f32 %v114_v41, %v80_v42 }
 0x125   :  { %v96_v51 = vadd.f32 %v93_v46, %v92_v48 }
 0x126   :  { %v85_v47 = vpop.permute.xlu1 %84 }
 0x127   :  { %v94_v49 = vmul.f32 %v117_v44, %v85_v47 }
 0x129   :  { %v97_v53 = vadd.f32 %v96_v51, %v94_v49 }
 0x12a   :  { %v90_v52 = vpop.permute.xlu1 %89 }
 0x12b   :  { %v95_v54 = vmul.f32 %v118_v50, %v90_v52 }
 0x12d   :  { %v98_v55 = vadd.f32 %v97_v53, %v95_v54 }
 0x12f   :  { %v99_v56 = vrot.slane %v98_v55, 4 }
 0x131   :  { %v100_v57 = vadd.f32 %v99_v56, %v98_v55 }
 0x133   :  { %v101_v58 = vrot.slane %v100_v57, 2 }
 0x135   :  { %v102_v60 = vadd.f32 %v101_v58, %v100_v57 }
 0x137   :  { %v103_v62 = vrot.slane %v102_v60, 1 }
 0x139   :  { %v104_v63 = vadd.f32 %v103_v62, %v102_v60 }
 0x13b   :  { %v105_v0 = vadd.f32 %v104_v63, %v28_v61 }
 0x13d   :  { %106 = vst [vmem:[%s198_s4] sm:$0x1] %v105_v0 }

</bundles_post_ra>
